<compile_context>
chip_gen: v7x
topology: tpu7x:2x2x1
jax: 0.10.0
libtpu: 0.0.40
codegen_flags: <defaults>
</compile_context>

<pallas_src>
import math

import jax
import jax.numpy as jnp
from jax.experimental import pallas as pl
from jax.experimental.pallas import tpu as pltpu


def _flatten_copy_kernel(x_ref, o_ref):
    # One lane-dense (N, TILE_F) tile: straight identity copy.
    o_ref[...] = x_ref[...]


def _pick_lane_tile(f):
    # Largest 128-multiple tile that (a) evenly divides f and (b) yields at
    # least 2 grid steps (pipelining + both TCs on v7x).  Falls back to the
    # full extent, which is always a legal block dim.
    for t in (4096, 2048, 1024, 512, 256, 128):
        if f % t == 0 and f // t >= 2:
            return t
    return f


def flatten_layer(x):
    """Pallas equivalent of FlattenLayer.forward: x.view(x.shape[0], -1)."""
    n = x.shape[0]
    f = math.prod(x.shape[1:])

    # Zero-cost reshape of the contiguous input to a lane-dense 2D layout:
    # rows = batch, lanes = flattened features (1024 here, a multiple of 128).
    x2 = x.reshape(n, f)

    tile_f = _pick_lane_tile(f)
    grid = (f // tile_f,)

    return pl.pallas_call(
        _flatten_copy_kernel,
        out_shape=jax.ShapeDtypeStruct((n, f), x.dtype),
        grid=grid,
        in_specs=[pl.BlockSpec((n, tile_f), lambda j: (0, j))],
        out_specs=pl.BlockSpec((n, tile_f), lambda j: (0, j)),
        compiler_params=pltpu.CompilerParams(
            dimension_semantics=("parallel",),
            vmem_limit_bytes=64 << 20,
        ),
    )(x2)


if __name__ == "__main__":
    key = jax.random.PRNGKey(0)
    # Small NCHW input consistent with the module's forward.
    x = jax.random.normal(key, (2, 4, 16, 16), dtype=jnp.float32)

    out = flatten_layer(x)
    out = jax.block_until_ready(out)

    # Reference: exactly what x.view(x.shape[0], -1) produces.
    ref = x.reshape(x.shape[0], -1)
    assert out.shape == (2, 4 * 16 * 16), out.shape
    assert out.dtype == x.dtype, out.dtype
    assert jnp.array_equal(out, ref), "flatten output mismatch"

    print("KERNEL_OK")
</pallas_src>

<mosaic_0001>
module attributes {stable_mosaic.version = 11 : i64} {
  func.func @_flatten_copy_kernel(%arg0: i32, %arg1: memref<2x512xf32, #tpu.memory_space<vmem>>, %arg2: memref<2x512xf32, #tpu.memory_space<vmem>>) attributes {dimension_semantics = [#tpu.dimension_semantics<parallel>], iteration_bounds = array<i64: 2>, scalar_prefetch = 0 : i64, scratch_operands = 0 : i64, tpu.core_type = #tpu.core_type<tc>, window_params = [{transform_indices = @transform_0, window_bounds = array<i64: 2, 512>}, {transform_indices = @transform_1, window_bounds = array<i64: 2, 512>}]} {
    %c0 = arith.constant 0 : index
    %c0_0 = arith.constant 0 : index
    %0 = vector.load %arg1[%c0, %c0_0] : memref<2x512xf32, #tpu.memory_space<vmem>>, vector<2x512xf32>
    %c0_1 = arith.constant 0 : index
    %c0_2 = arith.constant 0 : index
    %1 = vector.load %arg2[%c0_1, %c0_2] : memref<2x512xf32, #tpu.memory_space<vmem>>, vector<2x512xf32>
    tpu.vector_store %arg2[%c0_1, %c0_2], %0 {strides = array<i32>} : memref<2x512xf32, #tpu.memory_space<vmem>>, vector<2x512xf32>,
    return
  }
  func.func @transform_0(%arg0: i32) -> (i32, i32) {
    %c0_i32 = arith.constant 0 : i32
    %c0_i32_0 = arith.constant 0 : i32
    return %c0_i32, %arg0 : i32, i32
  }
  func.func @transform_1(%arg0: i32) -> (i32, i32) {
    %c0_i32 = arith.constant 0 : i32
    %c0_i32_0 = arith.constant 0 : i32
    return %c0_i32, %arg0 : i32, i32
  }
}

</mosaic_0001>

<bundles_post_ra>
// kernel: tpu_custom_call.1
= control target key start
LH: loop header
LB: loop body
LE: loop exit
PB: predicated region body
PF: predicated region fallthrough
CT: control target
= control target key end

     0   :  { %6 = vsyncpa [#allocation3], 0  ;;  %s555_s0 = inlined_call_operand.hbm [shape: f32[2,1024], index: 0, kind: input, shape index: {}]   ;;  %s556_s1 = inlined_call_operand.hbm [shape: f32[2,1024], index: 1, kind: output, shape index: {}]  }
   0x1   :  { %8 = vsyncpa [#allocation3 + $0x1], 0 }
   0x2   :  { %9 = vsyncpa [#allocation4], 0 }
   0x3   :  { %11 = vsyncpa [#allocation4 + $0x1], 0  ;;  %s394_s6 = smov 0   ;;  %s396_s7 = smov 0  }
   0x4   :  { %s398_s8 = smov 0   ;;  %s400_s9 = smov 0  }
   0x5 LB: > { %s415_s10 = sadd.s32 4294967295, %s380_s9   ;;  %s222_s11 = sadd.s32 4294967294, %s380_s9   ;;  %s380_s9 = sphi %s400_s9, %s571_s9   ;;  %s376_s8 = sphi %s398_s8, %s570_s8   ;;  %s372_s7 = sphi %s396_s7, %s569_s7   ;;  %s368_s6 = sphi %s394_s6, %s568_s6  }
   0x6   : > { %s419_s12 = sadd.s32 1, %s380_s9   ;;  %s24_s13 = sadd.s32 1, %s376_s8 }
   0x7   : > { %s21_s14 = ssub.s32 %s380_s9, %s419_s12  ;;  %p31_p0 = scmp.ne.s32.totalorder %s376_s8, %s372_s7 }
   0x8   : > { %p22_p1 = scmp.eq.s32.totalorder %s21_s14, 0  ;;  %p32_p2 = scmp.eq.s32.totalorder %s380_s9, 0 }
   0x9   : > { %p37_p3 = scmp.ne.s32.totalorder %s372_s7, %s368_s6  ;;  %p38_p4 = scmp.eq.s32.totalorder %s415_s10, 0 }
   0xa   : > { %s431_s15 = scalar_select %p22_p1, %s376_s8, %s24_s13  }
   0xb   : > { %p433_p5 = por %p32_p2, %p31_p0  ;;  %p437_p6 = por %p38_p4, %p37_p3 }
   0xc   : > { %p61_p7 = scmp.eq.s32.totalorder %s415_s10, 1  ;;  %p67_p8 = scmp.eq.s32.totalorder %s222_s11, 1 }
   0xd   : > { %p250_p10 = scmp.lt.s32.totalorder %s380_s9, 2  ;;  %s87_s20 = sand.u32 1, %s376_s8  }
   0xe   : > { %p444_p11 = por %p61_p7, %p31_p0  ;;  %p448_p12 = por %p67_p8, %p37_p3 }
   0xf   : > { %s236_s21 = sshll.u32 %s380_s9, 7  ;;  %s225_s22 = sshll.u32 %s87_s20, 3 }
  0x10   : > { %s560_s18 = scalar_select %p444_p11, 1, 0 }
  0x11   : > { %s561_s19 = scalar_select %p448_p12, 1, 0 }
  0x12   : > { %s457_s25 = scalar_lea.hbm %s555_s0, %s236_s21  ;;  %s91_s26 = scalar_lea.vmem [#allocation2], %s225_s22 }
  0x13   : > { %s99_s27 = sshll.u32 %s91_s26, 4  ;;  %p461_p13 = pnand %p250_p10, %p433_p5  ;;  %s465_s27 = int_to_ptr.vmem [resolvable:$true] %s99_s27 }
  0x14   : > { %s88_s29 = scalar_lea.sflag [#allocation3], %s87_s20  ;;  %s284_s30 = scalar_lea.hbm %s457_s25, 128 }
  0x15   : > { %p285_p2 = scmp.ne.s32.totalorder %s457_s25, %s284_s30  ;;  %p286_p3 = pneg %p461_p13 }
  0x16   : > { %s289_s4 = scalar_lea.hbm %s555_s0, 256  ;;  %p290_p5 = scmp.lt.u32.totalorder %s457_s25, %s555_s0 }
  0x17   : > { %p287_p4 = pnand %p286_p3, %p285_p2  ;;  %p291_p8 = scmp.lt.u32.totalorder %s289_s4, %s284_s30 }
  0x18   : > { %p293_p9 = scmp.lt.u32.totalorder %s284_s30, %s457_s25 }
  0x19   : > { %p288_p7 = pneg %p287_p4  ;;  %p292_p10 = por %p291_p8, %p290_p5 }
  0x1b   : > { %p294_p0 = por %p293_p9, %p292_p10 }
  0x1d   : > { %p295_p1 = pnand %p294_p0, %p288_p7 }
  0x1f   : > { %298 = shalt.err (!%p295_p1)
}
  0x20   : > { %s299_s13 = scalar_lea.vmem %s465_s27, 128  ;;  %s382_s14 = smov [#allocation2]  }
  0x21   : > { %p300_p2 = scmp.ne.s32.totalorder %s465_s27, %s299_s13  ;;  %s304_s16 = sshll.u32 %s382_s14, 4  ;;  %s305_s16 = int_to_ptr.vmem [resolvable:$false] %s304_s16 }
  0x22   : > { %s306_s20 = scalar_lea.vmem %s305_s16, 256  ;;  %p307_p11 = scmp.lt.s32.totalorder %s465_s27, %s305_s16 }
  0x23   : > { %p302_p4 = pnand %p300_p2, %p286_p3  ;;  %p308_p5 = scmp.lt.s32.totalorder %s306_s20, %s299_s13 }
  0x25   : > { %p303_p12 = pneg %p302_p4  ;;  %p309_p8 = por %p308_p5, %p307_p11 }
  0x27   : > { %p310_p9 = pnand %p309_p8, %p303_p12 }
  0x29   : > { %313 = shalt.err (!%p310_p9)
}
  0x2a   : > { %245 = dma.hbm_to_vmem [thread:$0]  (!%p461_p13), %s457_s25, 128, %s465_s27, %s88_s29  }
  0x2b   : > { %p563_p0 = scmp.lt.s32.totalorder %s380_s9, 3  ;;  %p564_p1 = scmp.ge.s32.totalorder %s380_s9, 1 }
  0x2d   : > { %p105_p3 = pnand %p564_p1, %p563_p0 }
  0x2e   : > { %s499_s21 = sand.u32 (!%p105_p3), 1, %s372_s7  }
  0x2f   : > { %108 = sbr.rel (%p105_p3) target bundleno = 81 (0x51), region = 24  ;;  %s229_s22 = sshll.u32 (!%p105_p3), %s499_s21, 3 }
  0x30   : > { %s111_s23 = scalar_lea.sflag (!%p105_p3), [#allocation3], %s499_s21  ;;  %s114_s24 = scalar_lea.vmem (!%p105_p3), [#allocation2], %s229_s22 }
  0x36   : > { %359 = dma.done.wait (%p437_p6), %s111_s23, 128  }
  0x37   : > { %361 = vsyncadd (%p437_p6), %s111_s23, 4294967168  ;;  %s132_s25 = scalar_lea.vmem [#allocation5], %s229_s22  ;;  %s237_s27 = sshll.u32 %s415_s10, 7  ;;  %v135_v0 = vld [vmem:[%s114_s24] sm:$0xff] }
  0x38   : > { %s152_s26 = sshll.u32 %s132_s25, 4  ;;  %s513_s30 = scalar_lea.hbm %s556_s1, %s237_s27  ;;  %136 = vst [vmem:[%s132_s25] sm:$0xff] %v135_v0  ;;  %s508_s26 = int_to_ptr.vmem [resolvable:$true] %s152_s26 }
  0x39   : > { %s138_s17 = scalar_lea.sflag [#allocation4], %s499_s21  ;;  %s314_s2 = scalar_lea.vmem %s508_s26, 128 }
  0x3a   : > { %p315_p6 = scmp.ne.s32.totalorder %s508_s26, %s314_s2  ;;  %p565_p11 = scmp.ne.s32.totalorder %s560_s18, 0 }
  0x3b   : > { %s383_s3 = smov [#allocation5]  }
  0x3c   : > { %p316_p12 = pnand %p315_p6, %p565_p11  ;;  %s318_s10 = sshll.u32 %s383_s3, 4  ;;  %s319_s10 = int_to_ptr.vmem [resolvable:$false] %s318_s10 }
  0x3d   : > { %s320_s4 = scalar_lea.vmem %s319_s10, 256  ;;  %p321_p7 = scmp.lt.s32.totalorder %s508_s26, %s319_s10 }
  0x3e   : > { %p317_p13 = pneg %p316_p12  ;;  %p322_p10 = scmp.lt.s32.totalorder %s320_s4, %s314_s2 }
  0x40   : > { %p323_p2 = por %p322_p10, %p321_p7 }
  0x42   : > { %p324_p4 = pnand %p323_p2, %p317_p13 }
  0x44   : > { %327 = shalt.err (!%p324_p4)
}
  0x45   : > { %s328_s5 = scalar_lea.hbm %s513_s30, 128  ;;  %s332_s14 = scalar_lea.hbm %s556_s1, 256 }
  0x46   : > { %p329_p5 = scmp.ne.s32.totalorder %s513_s30, %s328_s5  ;;  %p333_p0 = scmp.lt.u32.totalorder %s513_s30, %s556_s1 }
  0x47   : > { %p334_p1 = scmp.lt.u32.totalorder %s332_s14, %s328_s5  ;;  %p336_p6 = scmp.lt.u32.totalorder %s328_s5, %s513_s30 }
  0x48   : > { %p330_p8 = pnand %p329_p5, %p565_p11 }
  0x49   : > { %p335_p3 = por %p334_p1, %p333_p0 }
  0x4a   : > { %p331_p9 = pneg %p330_p8 }
  0x4b   : > { %p337_p12 = por %p336_p6, %p335_p3 }
  0x4d   : > { %p338_p13 = pnand %p337_p12, %p331_p9 }
  0x4f   : > { %341 = shalt.err (!%p338_p13)
}
  0x50   : > { %240 = dma.vmem_to_hbm [thread:$0]  (%p565_p11), %s508_s26, 128, %s513_s30, %s138_s17  }
  0x51 PF: > { %s164_s21 = sand.u32 1, %s368_s6   ;;  %p566_p7 = scmp.ne.s32.totalorder %s561_s19, 0 }
  0x52   : > { %p567_p10 = scmp.ge.s32.totalorder %s380_s9, 2  ;;  %s165_s22 = scalar_lea.sflag [#allocation4], %s164_s21 }
  0x54   : > { %p247_p2 = pnand %p567_p10, %p566_p7 }
  0x56   : > { %363 = dma.done.wait (!%p247_p2), %s165_s22, 128  }
  0x57   : > { %365 = vsyncadd (!%p247_p2), %s165_s22, 4294967168  ;;  %p14_p4 = scmp.ge.s32.totalorder %s419_s12, 4   ;;  %s568_s6 = smov %s372_s7 }
  0x58   : > { %s569_s7 = smov %s376_s8  ;;  %s570_s8 = smov %s431_s15 }
  0x59   : > { %s571_s9 = smov %s419_s12  ;;  %16 = sbr.rel (!%p14_p4) target bundleno = 5 (0x5), region = 69 }
  0x60   :  { %170 = vsyncpa [#allocation3], 1 }
  0x61   :  { %172 = vsyncpa [#allocation3 + $0x1], 1 }
  0x62   :  { %173 = vsyncpa [#allocation4], 1 }
  0x63   :  { %175 = vsyncpa [#allocation4 + $0x1], 1 }

</bundles_post_ra>
